<compile_context>
chip_gen: v6e
topology: v6e:2x2x1
jax: 0.10.0
libtpu: 0.0.40
codegen_flags: <defaults>
</compile_context>

<pallas_src>
import math

import jax
import jax.numpy as jnp
from jax import lax
from jax.experimental import pallas as pl
from jax.experimental.pallas import tpu as pltpu


def _layer_norm(x, g, eps=1e-5):
    # LayerNorm over the last (channel) axis, biased variance, eps=1e-5 (f32).
    mean = jnp.mean(x, axis=-1, keepdims=True)
    var = jnp.mean(jnp.square(x - mean), axis=-1, keepdims=True)
    return (x - mean) * lax.rsqrt(var + eps) * g


def make_cross_attention_kernel(heads, dim_head, exp_bf16):
    def kernel(x_ref, k_ref, v_ref, wq_ref, wout_ref, gn_ref, go_ref,
               nkv_ref, o_ref):
        x = x_ref[...]                                   # (tq, dim)   f32
        tq = x.shape[0]

        # pre-norm on the queries (norm_context is Identity by default)
        xn = _layer_norm(x, gn_ref[...])

        # Q projection (scale already folded into wq): bf16 MXU, f32 acc
        q2 = jnp.dot(xn.astype(jnp.bfloat16), wq_ref[...],
                     preferred_element_type=jnp.float32)          # (tq, h*d)
        qh = jnp.transpose(q2.reshape(tq, heads, dim_head), (1, 0, 2))
        # qh: (h, tq, d) f32 -- the only transpose in the kernel.

        nkv = nkv_ref[...]                               # (2, d) f32
        nk = nkv[0:1, :].reshape(1, 1, dim_head)
        nv = nkv[1:2, :].reshape(1, 1, dim_head)

        # logits, head-leading everywhere; k/v arrive pre-projected in bf16
        sim = jnp.einsum('hid,hjd->hij',
                         qh.astype(jnp.bfloat16), k_ref[...],
                         preferred_element_type=jnp.float32)      # (h, tq, m)
        sim_null = jnp.sum(qh * nk, axis=-1)                      # (h, tq) f32

        # softmax over (null key + context keys); max & denom stay in f32
        mx = jnp.maximum(jnp.max(sim, axis=-1), sim_null)         # (h, tq)
        p_null = jnp.exp(sim_null - mx)                           # (h, tq) f32
        if exp_bf16:
            # bf16 exp (v6e/v7x only): relieves the single EUP slot and feeds
            # the PV matmul directly without a separate cast pass.
            p = jnp.exp((sim - mx[:, :, None]).astype(jnp.bfloat16))
            denom = jnp.sum(p.astype(jnp.float32), axis=-1) + p_null
        else:
            p32 = jnp.exp(sim - mx[:, :, None])                   # f32
            denom = jnp.sum(p32, axis=-1) + p_null
            p = p32.astype(jnp.bfloat16)

        # attn @ v (batched over heads) + null-value contribution
        out = jnp.einsum('hij,hjd->hid', p, v_ref[...],
                         preferred_element_type=jnp.float32)      # (h, tq, d)
        inv = pl.reciprocal(denom, approx=True)                   # (h, tq)
        out = (out + p_null[:, :, None] * nv) * inv[:, :, None]   # (h, tq, d)

        # output projection: head-batched matmul + sum (no head-merge relayout)
        proj = jnp.einsum('hid,hdo->hio',
                          out.astype(jnp.bfloat16), wout_ref[...],
                          preferred_element_type=jnp.float32)     # (h, tq, dim)
        proj = jnp.sum(proj, axis=0)                              # (tq, dim)

        # to_out LayerNorm
        o_ref[...] = _layer_norm(proj, go_ref[...]).astype(o_ref.dtype)

    return kernel


def cross_attention(x, context, w_q, w_kv, w_out, g_norm, g_out, null_kv,
                    *, heads, dim_head):
    """x: (B, n, dim); context: (B, m, context_dim); PyTorch Linear weights."""
    B, n, dim = x.shape
    _, m, cdim = context.shape
    inner = heads * dim_head
    scale = dim_head ** (-0.5)
    f32, bf16 = jnp.float32, jnp.bfloat16

    # ---- weight prep (once, outside the grid loop) -------------------------
    # PyTorch Linear weight is (out, in). Fold the attention scale into wq.
    wq_t = (jnp.transpose(w_q).astype(f32) * scale).astype(bf16)   # (dim, h*d)
    wout3 = jnp.transpose(w_out).reshape(heads, dim_head, dim).astype(bf16)
    g1 = g_norm.reshape(1, dim).astype(f32)
    g2 = g_out.reshape(1, dim).astype(f32)
    nkv = null_kv.astype(f32)                                      # (2, d)

    # ---- KV projection hoisted out of the per-tile kernel ------------------
    wk = w_kv[:inner].reshape(heads, dim_head, cdim)
    wv = w_kv[inner:].reshape(heads, dim_head, cdim)
    k = jnp.einsum('bmc,hdc->bhmd', context, wk).astype(bf16)      # (B,h,m,d)
    v = jnp.einsum('bmc,hdc->bhmd', context, wv).astype(bf16)      # (B,h,m,d)

    # ---- generation-aware tile size and VMEM limit --------------------------
    try:
        vmem_cap = int(pltpu.get_tpu_info().vmem_capacity_bytes)
    except Exception:
        vmem_cap = 128 * 1024 * 1024
    small_vmem = vmem_cap <= 64 * 1024 * 1024            # v7x-class
    vmem_limit = int(vmem_cap * (0.75 if small_vmem else 0.80))
    budget = int(vmem_limit * 0.6)                        # per-step working set

    def step_bytes(t):
        blocks = (2 * t * dim * 4                         # x block (2 bufs)
                  + 2 * t * dim * 4                       # out block (2 bufs)
                  + 2 * 2 * heads * m * dim_head * 2      # k+v bf16 (2 bufs)
                  + 2 * (dim * inner + inner * dim))      # weights (1 buf, bf16)
        live = (heads * t * m * 4                         # sim / p
                + heads * t * dim_head * 4                # out
                + heads * t * dim * 4                     # per-head proj
                + 2 * t * inner * 4)                      # q2 / qh
        return blocks + live

    candidates = (256, 128, 64, 32, 16, 8) if small_vmem else (512, 256, 128, 64, 32, 16, 8)
    tq = n  # TODO(synk): if n has no small divisor, pad n instead of one big tile.
    for t in candidates:
        if n % t == 0 and step_bytes(t) <= budget:
            tq = t
            break
    # make sure the parallel grid has enough steps for pipelining / megacore
    while tq > 8 and B * (n // tq) < 4 and tq % 2 == 0 and n % (tq // 2) == 0:
        tq //= 2

    # ---- bf16 exp only where the EUP supports it (v6e / v7x) ----------------
    try:
        kind = jax.devices()[0].device_kind.lower()
    except Exception:
        kind = ""
    exp_bf16 = any(s in kind for s in ("v6", "v7", "7x"))

    # ---- cost estimate (advisory, whole call) -------------------------------
    flops = int(4 * B * n * (dim * inner + heads * m * dim_head))
    transcendentals = int(B * heads * n * (m + 1))
    bytes_accessed = int(x.size * 4 + k.size * 2 + v.size * 2
                         + (wq_t.size + wout3.size) * 2
                         + (g1.size + g2.size + nkv.size) * 4
                         + B * n * dim * 4)
    cost = pl.CostEstimate(flops=flops, transcendentals=transcendentals,
                           bytes_accessed=bytes_accessed)

    def const_spec(shape):
        rank = len(shape)
        # grid-invariant block: single-buffer it (no point double-buffering)
        return pl.BlockSpec(shape, lambda b, i: (0,) * rank,
                            pipeline_mode=pl.Buffered(1))

    kernel = make_cross_attention_kernel(heads, dim_head, exp_bf16)
    return pl.pallas_call(
        kernel,
        out_shape=jax.ShapeDtypeStruct((B, n, dim), x.dtype),
        grid_spec=pltpu.PrefetchScalarGridSpec(
            num_scalar_prefetch=0,
            grid=(B, n // tq),
            in_specs=[
                pl.BlockSpec((None, tq, dim), lambda b, i: (b, i, 0)),
                pl.BlockSpec((None, heads, m, dim_head), lambda b, i: (b, 0, 0, 0)),
                pl.BlockSpec((None, heads, m, dim_head), lambda b, i: (b, 0, 0, 0)),
                const_spec((dim, inner)),
                const_spec((heads, dim_head, dim)),
                const_spec((1, dim)),
                const_spec((1, dim)),
                const_spec((2, dim_head)),
            ],
            out_specs=pl.BlockSpec((None, tq, dim), lambda b, i: (b, i, 0)),
        ),
        compiler_params=pltpu.CompilerParams(
            dimension_semantics=("parallel", "parallel"),
            vmem_limit_bytes=vmem_limit),
        cost_estimate=cost,
    )(x, k, v, wq_t, wout3, g1, g2, nkv)


def cross_attention_reference(x, context, w_q, w_kv, w_out, g_norm, g_out,
                              null_kv, *, heads, dim_head):
    """Pure-JAX mirror of the PyTorch forward (defaults), for correctness."""
    b, n, dim = x.shape
    _, m, cdim = context.shape
    inner = heads * dim_head
    scale = dim_head ** (-0.5)
    eps = 1e-5
    hp = lax.Precision.HIGHEST

    def ln(t, g):
        mean = jnp.mean(t, axis=-1, keepdims=True)
        var = jnp.mean((t - mean) ** 2, axis=-1, keepdims=True)
        return (t - mean) * lax.rsqrt(var + eps) * g

    xn = ln(x, g_norm)
    q = jnp.einsum('bnd,ed->bne', xn, w_q, precision=hp)
    kv = jnp.einsum('bmc,ec->bme', context, w_kv, precision=hp)
    k, v = kv[..., :inner], kv[..., inner:]

    def split_heads(t):
        B, L, _ = t.shape
        return jnp.transpose(t.reshape(B, L, heads, dim_head), (0, 2, 1, 3))

    q, k, v = map(split_heads, (q, k, v))
    nk = jnp.broadcast_to(null_kv[0], (b, heads, 1, dim_head))
    nv = jnp.broadcast_to(null_kv[1], (b, heads, 1, dim_head))
    k = jnp.concatenate([nk, k], axis=2)
    v = jnp.concatenate([nv, v], axis=2)
    q = q * math.sqrt(scale)
    k = k * math.sqrt(scale)
    sim = jnp.einsum('bhid,bhjd->bhij', q, k, precision=hp)
    attn = jax.nn.softmax(sim, axis=-1)
    out = jnp.einsum('bhij,bhjd->bhid', attn, v, precision=hp)
    out = jnp.transpose(out, (0, 2, 1, 3)).reshape(b, n, inner)
    out = jnp.einsum('bne,de->bnd', out, w_out, precision=hp)
    return ln(out, g_out)


if __name__ == "__main__":
    B, n, m = 2, 8, 8
    dim, heads, dim_head = 32, 2, 16
    context_dim = dim
    inner = heads * dim_head

    key = jax.random.PRNGKey(0)
    kx, kc, kq, kkv, ko, knull = jax.random.split(key, 6)

    x = jax.random.normal(kx, (B, n, dim), jnp.float32)
    context = jax.random.normal(kc, (B, m, context_dim), jnp.float32)
    # PyTorch nn.Linear weight layouts: (out_features, in_features)
    w_q = jax.random.normal(kq, (inner, dim), jnp.float32) * 0.05
    w_kv = jax.random.normal(kkv, (2 * inner, context_dim), jnp.float32) * 0.05
    w_out = jax.random.normal(ko, (dim, inner), jnp.float32) * 0.05
    null_kv = jax.random.normal(knull, (2, dim_head), jnp.float32)
    g_norm = jnp.ones((dim,), jnp.float32)   # LayerNorm g (pre-norm)
    g_out = jnp.ones((dim,), jnp.float32)    # LayerNorm g (inside to_out)

    out = cross_attention(x, context, w_q, w_kv, w_out, g_norm, g_out,
                          null_kv, heads=heads, dim_head=dim_head)
    out = jax.block_until_ready(out)

    ref = cross_attention_reference(x, context, w_q, w_kv, w_out, g_norm,
                                    g_out, null_kv,
                                    heads=heads, dim_head=dim_head)
    assert out.shape == (B, n, dim)
    assert bool(jnp.all(jnp.isfinite(out)))
    assert bool(jnp.allclose(out, ref, atol=2e-2, rtol=2e-2)), \
        float(jnp.max(jnp.abs(out - ref)))

    print("KERNEL_OK")
</pallas_src>

<mosaic_0001>
module attributes {stable_mosaic.version = 11 : i64} {
  func.func @kernel(%arg0: i32, %arg1: i32, %arg2: memref<1x8x32xf32, #tpu.memory_space<vmem>>, %arg3: memref<1x2x8x16xbf16, #tpu.memory_space<vmem>>, %arg4: memref<1x2x8x16xbf16, #tpu.memory_space<vmem>>, %arg5: memref<32x32xbf16, #tpu.memory_space<vmem>>, %arg6: memref<2x16x32xbf16, #tpu.memory_space<vmem>>, %arg7: memref<1x32xf32, #tpu.memory_space<vmem>>, %arg8: memref<1x32xf32, #tpu.memory_space<vmem>>, %arg9: memref<2x16xf32, #tpu.memory_space<vmem>>, %arg10: memref<1x8x32xf32, #tpu.memory_space<vmem>>) attributes {dimension_semantics = [#tpu.dimension_semantics<parallel>, #tpu.dimension_semantics<parallel>], iteration_bounds = array<i64: 2, 1>, scalar_prefetch = 0 : i64, scratch_operands = 0 : i64, tpu.core_type = #tpu.core_type<tc>, window_params = [{transform_indices = @transform_0, window_bounds = array<i64: 1, 8, 32>}, {transform_indices = @transform_1, window_bounds = array<i64: 1, 2, 8, 16>}, {transform_indices = @transform_2, window_bounds = array<i64: 1, 2, 8, 16>}, {pipeline_mode = #tpu.pipeline_mode<synchronous>, transform_indices = @transform_3, window_bounds = array<i64: 32, 32>}, {pipeline_mode = #tpu.pipeline_mode<synchronous>, transform_indices = @transform_4, window_bounds = array<i64: 2, 16, 32>}, {pipeline_mode = #tpu.pipeline_mode<synchronous>, transform_indices = @transform_5, window_bounds = array<i64: 1, 32>}, {pipeline_mode = #tpu.pipeline_mode<synchronous>, transform_indices = @transform_6, window_bounds = array<i64: 1, 32>}, {pipeline_mode = #tpu.pipeline_mode<synchronous>, transform_indices = @transform_7, window_bounds = array<i64: 2, 16>}, {transform_indices = @transform_8, window_bounds = array<i64: 1, 8, 32>}]} {
    %c0 = arith.constant 0 : index
    %c0_0 = arith.constant 0 : index
    %c0_1 = arith.constant 0 : index
    %0 = vector.load %arg2[%c0, %c0_0, %c0_1] : memref<1x8x32xf32, #tpu.memory_space<vmem>>, vector<1x8x32xf32>
    %1 = vector.shape_cast %0 : vector<1x8x32xf32> to vector<8x32xf32>
    %c0_2 = arith.constant 0 : index
    %c0_3 = arith.constant 0 : index
    %2 = vector.load %arg7[%c0_2, %c0_3] : memref<1x32xf32, #tpu.memory_space<vmem>>, vector<1x32xf32>
    %cst = arith.constant dense<0.000000e+00> : vector<8xf32>
    %3 = vector.multi_reduction <add>, %1, %cst [1] : vector<8x32xf32> to vector<8xf32>
    %4 = vector.shape_cast %3 : vector<8xf32> to vector<8x1xf32>
    %cst_4 = arith.constant 3.200000e+01 : f32
    %5 = vector.broadcast %cst_4 : f32 to vector<8x1xf32>
    %6 = arith.divf %4, %5 : vector<8x1xf32>
    %7 = vector.broadcast %6 : vector<8x1xf32> to vector<8x32xf32>
    %8 = arith.subf %1, %7 : vector<8x32xf32>
    %9 = arith.mulf %8, %8 : vector<8x32xf32>
    %cst_5 = arith.constant dense<0.000000e+00> : vector<8xf32>
    %10 = vector.multi_reduction <add>, %9, %cst_5 [1] : vector<8x32xf32> to vector<8xf32>
    %11 = vector.shape_cast %10 : vector<8xf32> to vector<8x1xf32>
    %cst_6 = arith.constant 3.200000e+01 : f32
    %12 = vector.broadcast %cst_6 : f32 to vector<8x1xf32>
    %13 = arith.divf %11, %12 : vector<8x1xf32>
    %14 = vector.broadcast %6 : vector<8x1xf32> to vector<8x32xf32>
    %15 = arith.subf %1, %14 : vector<8x32xf32>
    %cst_7 = arith.constant 9.99999974E-6 : f32
    %16 = vector.broadcast %cst_7 : f32 to vector<8x1xf32>
    %17 = arith.addf %13, %16 : vector<8x1xf32>
    %18 = math.rsqrt %17 : vector<8x1xf32>
    %19 = vector.broadcast %18 : vector<8x1xf32> to vector<8x32xf32>
    %20 = arith.mulf %15, %19 : vector<8x32xf32>
    %21 = vector.broadcast %2 : vector<1x32xf32> to vector<8x32xf32>
    %22 = arith.mulf %20, %21 : vector<8x32xf32>
    %23 = arith.truncf %22 : vector<8x32xf32> to vector<8x32xbf16>
    %c0_8 = arith.constant 0 : index
    %c0_9 = arith.constant 0 : index
    %24 = vector.load %arg5[%c0_8, %c0_9] : memref<32x32xbf16, #tpu.memory_space<vmem>>, vector<32x32xbf16>
    %cst_10 = arith.constant dense<0.000000e+00> : vector<8x32xf32>
    %25 = tpu.matmul %23, %24, %cst_10 {dimension_numbers = #tpu.dot_dimension_numbers<[1], [0], [0], [1], [0, 0, 1, 1], [], []>} : vector<8x32xbf16>, vector<32x32xbf16>, vector<8x32xf32> -> vector<8x32xf32>
    %26 = vector.shape_cast %25 : vector<8x32xf32> to vector<8x2x16xf32>
    %27 = tpu.transpose %26, [1, 0, 2] : vector<8x2x16xf32> -> vector<2x8x16xf32>
    %c0_11 = arith.constant 0 : index
    %c0_12 = arith.constant 0 : index
    %28 = vector.load %arg9[%c0_11, %c0_12] : memref<2x16xf32, #tpu.memory_space<vmem>>, vector<2x16xf32>
    %29 = vector.extract_strided_slice %28 {offsets = [0, 0], sizes = [1, 16], strides = [1, 1]} : vector<2x16xf32> to vector<1x16xf32>
    %30 = vector.shape_cast %29 : vector<1x16xf32> to vector<1x1x16xf32>
    %31 = vector.extract_strided_slice %28 {offsets = [1, 0], sizes = [1, 16], strides = [1, 1]} : vector<2x16xf32> to vector<1x16xf32>
    %32 = vector.shape_cast %31 : vector<1x16xf32> to vector<1x1x16xf32>
    %33 = arith.truncf %27 : vector<2x8x16xf32> to vector<2x8x16xbf16>
    %c0_13 = arith.constant 0 : index
    %c0_14 = arith.constant 0 : index
    %c0_15 = arith.constant 0 : index
    %c0_16 = arith.constant 0 : index
    %34 = vector.load %arg3[%c0_13, %c0_14, %c0_15, %c0_16] : memref<1x2x8x16xbf16, #tpu.memory_space<vmem>>, vector<1x2x8x16xbf16>
    %35 = vector.shape_cast %34 : vector<1x2x8x16xbf16> to vector<2x8x16xbf16>
    "tpu.trace_start"() <{level = 10 : i32, message = "hid,hjd->hij"}> : () -> ()
    %cst_17 = arith.constant dense<0.000000e+00> : vector<2x8x8xf32>
    %36 = tpu.matmul %33, %35, %cst_17 {dimension_numbers = #tpu.dot_dimension_numbers<[2], [2], [1], [1], [0, 0, 0, 1, 1, 1], [0], [0]>} : vector<2x8x16xbf16>, vector<2x8x16xbf16>, vector<2x8x8xf32> -> vector<2x8x8xf32>
    "tpu.trace_stop"() : () -> ()
    %37 = vector.broadcast %30 : vector<1x1x16xf32> to vector<2x8x16xf32>
    %38 = arith.mulf %27, %37 : vector<2x8x16xf32>
    %cst_18 = arith.constant dense<0.000000e+00> : vector<2x8xf32>
    %39 = vector.multi_reduction <add>, %38, %cst_18 [2] : vector<2x8x16xf32> to vector<2x8xf32>
    %cst_19 = arith.constant dense<0xFF800000> : vector<2x8xf32>
    %40 = vector.multi_reduction <maximumf>, %36, %cst_19 [2] : vector<2x8x8xf32> to vector<2x8xf32>
    %41 = arith.maximumf %40, %39 : vector<2x8xf32>
    %42 = arith.subf %39, %41 : vector<2x8xf32>
    %43 = math.exp %42 : vector<2x8xf32>
    %44 = vector.shape_cast %41 : vector<2x8xf32> to vector<2x8x1xf32>
    %45 = vector.broadcast %44 : vector<2x8x1xf32> to vector<2x8x8xf32>
    %46 = arith.subf %36, %45 : vector<2x8x8xf32>
    %47 = math.exp %46 : vector<2x8x8xf32>
    %cst_20 = arith.constant dense<0.000000e+00> : vector<2x8xf32>
    %48 = vector.multi_reduction <add>, %47, %cst_20 [2] : vector<2x8x8xf32> to vector<2x8xf32>
    %49 = arith.addf %48, %43 : vector<2x8xf32>
    %50 = arith.truncf %47 : vector<2x8x8xf32> to vector<2x8x8xbf16>
    %c0_21 = arith.constant 0 : index
    %c0_22 = arith.constant 0 : index
    %c0_23 = arith.constant 0 : index
    %c0_24 = arith.constant 0 : index
    %51 = vector.load %arg4[%c0_21, %c0_22, %c0_23, %c0_24] : memref<1x2x8x16xbf16, #tpu.memory_space<vmem>>, vector<1x2x8x16xbf16>
    %52 = vector.shape_cast %51 : vector<1x2x8x16xbf16> to vector<2x8x16xbf16>
    "tpu.trace_start"() <{level = 10 : i32, message = "hij,hjd->hid"}> : () -> ()
    %cst_25 = arith.constant dense<0.000000e+00> : vector<2x8x16xf32>
    %53 = tpu.matmul %50, %52, %cst_25 {dimension_numbers = #tpu.dot_dimension_numbers<[2], [1], [1], [2], [0, 0, 0, 1, 1, 2], [0], [0]>} : vector<2x8x8xbf16>, vector<2x8x16xbf16>, vector<2x8x16xf32> -> vector<2x8x16xf32>
    "tpu.trace_stop"() : () -> ()
    %54 = tpu.reciprocal %49 {approx = true} : vector<2x8xf32> -> vector<2x8xf32>
    %55 = vector.shape_cast %43 : vector<2x8xf32> to vector<2x8x1xf32>
    %56 = vector.broadcast %55 : vector<2x8x1xf32> to vector<2x8x16xf32>
    %57 = vector.broadcast %32 : vector<1x1x16xf32> to vector<2x8x16xf32>
    %58 = arith.mulf %56, %57 : vector<2x8x16xf32>
    %59 = arith.addf %53, %58 : vector<2x8x16xf32>
    %60 = vector.shape_cast %54 : vector<2x8xf32> to vector<2x8x1xf32>
    %61 = vector.broadcast %60 : vector<2x8x1xf32> to vector<2x8x16xf32>
    %62 = arith.mulf %59, %61 : vector<2x8x16xf32>
    %63 = arith.truncf %62 : vector<2x8x16xf32> to vector<2x8x16xbf16>
    %c0_26 = arith.constant 0 : index
    %c0_27 = arith.constant 0 : index
    %c0_28 = arith.constant 0 : index
    %64 = vector.load %arg6[%c0_26, %c0_27, %c0_28] : memref<2x16x32xbf16, #tpu.memory_space<vmem>>, vector<2x16x32xbf16>
    "tpu.trace_start"() <{level = 10 : i32, message = "hid,hdo->hio"}> : () -> ()
    %cst_29 = arith.constant dense<0.000000e+00> : vector<2x8x32xf32>
    %65 = tpu.matmul %63, %64, %cst_29 {dimension_numbers = #tpu.dot_dimension_numbers<[2], [1], [1], [2], [0, 0, 0, 1, 1, 2], [0], [0]>} : vector<2x8x16xbf16>, vector<2x16x32xbf16>, vector<2x8x32xf32> -> vector<2x8x32xf32>
    "tpu.trace_stop"() : () -> ()
    %cst_30 = arith.constant dense<0.000000e+00> : vector<8x32xf32>
    %66 = vector.multi_reduction <add>, %65, %cst_30 [0] : vector<2x8x32xf32> to vector<8x32xf32>
    %c0_31 = arith.constant 0 : index
    %c0_32 = arith.constant 0 : index
    %67 = vector.load %arg8[%c0_31, %c0_32] : memref<1x32xf32, #tpu.memory_space<vmem>>, vector<1x32xf32>
    %cst_33 = arith.constant dense<0.000000e+00> : vector<8xf32>
    %68 = vector.multi_reduction <add>, %66, %cst_33 [1] : vector<8x32xf32> to vector<8xf32>
    %69 = vector.shape_cast %68 : vector<8xf32> to vector<8x1xf32>
    %cst_34 = arith.constant 3.200000e+01 : f32
    %70 = vector.broadcast %cst_34 : f32 to vector<8x1xf32>
    %71 = arith.divf %69, %70 : vector<8x1xf32>
    %72 = vector.broadcast %71 : vector<8x1xf32> to vector<8x32xf32>
    %73 = arith.subf %66, %72 : vector<8x32xf32>
    %74 = arith.mulf %73, %73 : vector<8x32xf32>
    %cst_35 = arith.constant dense<0.000000e+00> : vector<8xf32>
    %75 = vector.multi_reduction <add>, %74, %cst_35 [1] : vector<8x32xf32> to vector<8xf32>
    %76 = vector.shape_cast %75 : vector<8xf32> to vector<8x1xf32>
    %cst_36 = arith.constant 3.200000e+01 : f32
    %77 = vector.broadcast %cst_36 : f32 to vector<8x1xf32>
    %78 = arith.divf %76, %77 : vector<8x1xf32>
    %79 = vector.broadcast %71 : vector<8x1xf32> to vector<8x32xf32>
    %80 = arith.subf %66, %79 : vector<8x32xf32>
    %cst_37 = arith.constant 9.99999974E-6 : f32
    %81 = vector.broadcast %cst_37 : f32 to vector<8x1xf32>
    %82 = arith.addf %78, %81 : vector<8x1xf32>
    %83 = math.rsqrt %82 : vector<8x1xf32>
    %84 = vector.broadcast %83 : vector<8x1xf32> to vector<8x32xf32>
    %85 = arith.mulf %80, %84 : vector<8x32xf32>
    %86 = vector.broadcast %67 : vector<1x32xf32> to vector<8x32xf32>
    %87 = arith.mulf %85, %86 : vector<8x32xf32>
    %c0_38 = arith.constant 0 : index
    %c0_39 = arith.constant 0 : index
    %c0_40 = arith.constant 0 : index
    %88 = vector.load %arg10[%c0_38, %c0_39, %c0_40] : memref<1x8x32xf32, #tpu.memory_space<vmem>>, vector<1x8x32xf32>
    %89 = vector.shape_cast %88 : vector<1x8x32xf32> to vector<8x32xf32>
    %90 = vector.shape_cast %87 : vector<8x32xf32> to vector<1x8x32xf32>
    tpu.vector_store %arg10[%c0_38, %c0_39, %c0_40], %90 {strides = array<i32>} : memref<1x8x32xf32, #tpu.memory_space<vmem>>, vector<1x8x32xf32>,
    return
  }
  func.func @transform_0(%arg0: i32, %arg1: i32) -> (i32, i32, i32) {
    %c0_i32 = arith.constant 0 : i32
    %c0_i32_0 = arith.constant 0 : i32
    return %arg0, %arg1, %c0_i32 : i32, i32, i32
  }
  func.func @transform_1(%arg0: i32, %arg1: i32) -> (i32, i32, i32, i32) {
    %c0_i32 = arith.constant 0 : i32
    %c0_i32_0 = arith.constant 0 : i32
    %c0_i32_1 = arith.constant 0 : i32
    %c0_i32_2 = arith.constant 0 : i32
    return %arg0, %c0_i32, %c0_i32_0, %c0_i32_1 : i32, i32, i32, i32
  }
  func.func @transform_2(%arg0: i32, %arg1: i32) -> (i32, i32, i32, i32) {
    %c0_i32 = arith.constant 0 : i32
    %c0_i32_0 = arith.constant 0 : i32
    %c0_i32_1 = arith.constant 0 : i32
    %c0_i32_2 = arith.constant 0 : i32
    return %arg0, %c0_i32, %c0_i32_0, %c0_i32_1 : i32, i32, i32, i32
  }
  func.func @transform_3(%arg0: i32, %arg1: i32) -> (i32, i32) {
    %c0_i32 = arith.constant 0 : i32
    %c0_i32_0 = arith.constant 0 : i32
    %c0_i32_1 = arith.constant 0 : i32
    return %c0_i32, %c0_i32_0 : i32, i32
  }
  func.func @transform_4(%arg0: i32, %arg1: i32) -> (i32, i32, i32) {
    %c0_i32 = arith.constant 0 : i32
    %c0_i32_0 = arith.constant 0 : i32
    %c0_i32_1 = arith.constant 0 : i32
    %c0_i32_2 = arith.constant 0 : i32
    return %c0_i32, %c0_i32_0, %c0_i32_1 : i32, i32, i32
  }
  func.func @transform_5(%arg0: i32, %arg1: i32) -> (i32, i32) {
    %c0_i32 = arith.constant 0 : i32
    %c0_i32_0 = arith.constant 0 : i32
    %c0_i32_1 = arith.constant 0 : i32
    return %c0_i32, %c0_i32_0 : i32, i32
  }
  func.func @transform_6(%arg0: i32, %arg1: i32) -> (i32, i32) {
    %c0_i32 = arith.constant 0 : i32
    %c0_i32_0 = arith.constant 0 : i32
    %c0_i32_1 = arith.constant 0 : i32
    return %c0_i32, %c0_i32_0 : i32, i32
  }
  func.func @transform_7(%arg0: i32, %arg1: i32) -> (i32, i32) {
    %c0_i32 = arith.constant 0 : i32
    %c0_i32_0 = arith.constant 0 : i32
    %c0_i32_1 = arith.constant 0 : i32
    return %c0_i32, %c0_i32_0 : i32, i32
  }
  func.func @transform_8(%arg0: i32, %arg1: i32) -> (i32, i32, i32) {
    %c0_i32 = arith.constant 0 : i32
    %c0_i32_0 = arith.constant 0 : i32
    return %arg0, %arg1, %c0_i32 : i32, i32, i32
  }
}

</mosaic_0001>

<bundles_post_ra>
// kernel: tpu_custom_call.1
= control target key start
LH: loop header
LB: loop body
LE: loop exit
PB: predicated region body
PF: predicated region fallthrough
CT: control target
= control target key end

     0   :  { %s2003_s0 = inlined_call_operand.hbm [shape: f32[2,8,32], index: 0, kind: input, shape index: {}]   ;;  %s2004_s1 = inlined_call_operand.hbm [shape: bf16[2,2,8,16], index: 1, kind: input, shape index: {}]   ;;  %s2005_s2 = inlined_call_operand.hbm [shape: bf16[2,2,8,16], index: 2, kind: input, shape index: {}]   ;;  %s2006_s3 = inlined_call_operand.hbm [shape: bf16[32,32], index: 3, kind: input, shape index: {}]   ;;  %s2007_s4 = inlined_call_operand.hbm [shape: bf16[2,16,32], index: 4, kind: input, shape index: {}]   ;;  %s2008_s5 = inlined_call_operand.vmem [shape: f32[1,32], index: 5, kind: input, shape index: {}]   ;;  %s2009_s6 = inlined_call_operand.vmem [shape: f32[1,32], index: 6, kind: input, shape index: {}]   ;;  %s2010_s7 = inlined_call_operand.vmem [shape: f32[2,16], index: 7, kind: input, shape index: {}]   ;;  %s2011_s8 = inlined_call_operand.hbm [shape: f32[2,8,32], index: 8, kind: output, shape index: {}]  }
   0x1   :  { %2028 = sst [smem:[#allocation22_spill]] %s2004_s1 }
   0x2   :  { %2029 = sst [smem:[#allocation23_spill]] %s2006_s3 }
   0x3   :  { %2030 = sst [smem:[#allocation24_spill]] %s2009_s6 }
   0x4   :  { %2031 = sst [smem:[#allocation25_spill]] %s2011_s8 }
   0x5   :  { %13 = vsyncpa [#allocation3], 0 }
   0x6   :  { %15 = vsyncpa [#allocation3 + $0x1], 0 }
   0x7   :  { %16 = vsyncpa [#allocation6], 0 }
   0x8   :  { %18 = vsyncpa [#allocation6 + $0x1], 0 }
   0x9   :  { %19 = vsyncpa [#allocation9], 0 }
   0xa   :  { %20 = vsyncpa [#allocation4], 0 }
   0xb   :  { %22 = vsyncpa [#allocation4 + $0x1], 0  ;;  %s1686_s27 = smov 0   ;;  %s1688_s28 = smov 0  }
   0xc   :  { %s1690_s29 = smov 0   ;;  %s1692_s30 = smov 0  }
   0xd   :  { %s1694_s9 = smov 0   ;;  %s1696_s10 = smov 0  }
   0xe LB: > { %2032 = sst [smem:[#allocation16_spill]] %s1606_s27  ;;  %s1717_s11 = sadd.s32 4294967295, %s1626_s10   ;;  %s1626_s10 = sphi %s1696_s10, %s28_s10   ;;  %s1622_s9 = sphi %s1694_s9, %s2067_s9   ;;  %s1618_s30 = sphi %s1692_s30, %s2066_s30   ;;  %s1614_s29 = sphi %s1690_s29, %s2070_s29   ;;  %s1610_s28 = sphi %s1688_s28, %s2069_s28   ;;  %s1606_s27 = sphi %s1686_s27, %s2068_s27  }
   0xf   : > { %2033 = sst [smem:[#allocation17_spill]] %s1622_s9  ;;  %s1182_s12 = sadd.s32 4294967294, %s1626_s10  }
  0x10   : > { %2034 = sst [smem:[#allocation18_spill]] %s1626_s10  ;;  %p56_p0 = scmp.ne.s32.totalorder %s1614_s29, %s1610_s28 }
  0x11   : > { %p57_p1 = scmp.eq.s32.totalorder %s1626_s10, 0  ;;  %p62_p2 = scmp.ne.s32.totalorder %s1610_s28, %s1606_s27 }
  0x12   : > { %p2012_p3 = scmp.eq.s32.totalorder %s1717_s11, 0  ;;  %p245_p5 = scmp.eq.s32.totalorder %s1717_s11, 1 }
  0x13   : > { %p1726_p4 = por %p57_p1, %p56_p0  ;;  %p251_p7 = scmp.eq.s32.totalorder %s1182_s12, 1 }
  0x14   : > { %p1733_p6 = por %p2012_p3, %p62_p2  ;;  %p1737_p8 = por %p245_p5, %p56_p0 }
  0x15   : > { %p1183_p9 = scmp.ge.s32.totalorder %s1626_s10, 1  ;;  %p1742_p10 = por %p251_p7, %p62_p2 }
  0x16   : > { %s2036_s14 = scalar_select %p1733_p6, 1, 0 }
  0x17   : > { %s2037_s15 = scalar_select %p1737_p8, 1, 0 }
  0x18   : > { %s2038_s16 = scalar_select %p1742_p10, 1, 0 }
  0x19   : > { %p258_p11 = scmp.lt.s32.totalorder %s1626_s10, 3  ;;  %s1628_s18 = smov [#allocation8]  }
  0x1a   : > { %2039 = sst [smem:[#allocation19_spill]] %s2038_s16  ;;  %s270_s19 = sshll.u32 %s1628_s18, 4  ;;  %s271_s19 = int_to_ptr.vmem [resolvable:$true] %s270_s19 }
  0x1b   : > { %p1747_p12 = pnand %p1183_p9, %p258_p11  ;;  %s40_s21 = sadd.s32 1, %s1622_s9 }
  0x1c   : > { %s49_s22 = sadd.s32 1, %s1614_s29  ;;  %p1762_p2 = scmp.ge.s32.totalorder %s40_s21, 2 }
  0x1d   : > { %p1298_p13 = pneg %p1747_p12  ;;  %s1413_s24 = scalar_lea.vmem %s271_s19, 256 }
  0x1e   : > { %p1414_p7 = scmp.ne.s32.totalorder %s271_s19, %s1413_s24  ;;  %p1422_p0 = scmp.lt.s32.totalorder %s1413_s24, %s1413_s24 }
  0x1f   : > { %p1756_p1 = pnand %p1298_p13, %p2012_p3  ;;  %p1421_p13 = scmp.lt.s32.totalorder %s271_s19, %s271_s19 }
  0x21   : > { %p1404_p5 = pneg %p1756_p1  ;;  %p1423_p3 = por %p1422_p0, %p1421_p13 }
  0x23   : > { %p1416_p9 = pnand %p1414_p7, %p1404_p5 }
  0x25   : > { %p1417_p11 = pneg %p1416_p9 }
  0x27   : > { %p1424_p10 = pnand %p1423_p3, %p1417_p11 }
  0x29   : > { %1427 = shalt.err (!%p1424_p10)
}
  0x2a   : > { %s2017_s25 = smov 64   ;;  %s2019_s26 = smov 4  }
  0x2b   : > { %s2043_s3 = sld [smem:[#allocation23_spill]]  ;;  %s2072_s21 = smov (%p1762_p2, %s40_s21), 0 }
  0x2c   : > { %2044 = sst [smem:[#allocation20_spill]] %s2072_s21  ;;  %p1321_p3 = scmp.lt.s32.totalorder %s1626_s10, 2 }
  0x2d   : > { %s2016_s24 = sand.u32 1, %s1614_s29   ;;  %s44_s16 = ssub.s32 %s1622_s9, %s2072_s21 }
  0x2e   : > { %s1789_s27 = sshll.u32 %s2016_s24, 3  ;;  %p47_p10 = scmp.eq.s32.totalorder %s44_s16, 0 }
  0x2f   : > { %s1792_s8 = sshll.u32 %s1622_s9, 7  ;;  %p1796_p0 = pnand %p1321_p3, %p1726_p4 }
  0x30   : > { %s1802_s23 = scalar_select %p47_p10, %s1614_s29, %s49_s22  }
  0x31   : > { %1301 = dma.hbm_to_vmem [thread:$0]  (!%p1756_p1), %s2043_s3, 256, %s271_s19, [#allocation9], %s2017_s25, %s2017_s25, %s2019_s26  }
  0x32   : > { %s325_s19 = sand.u32 1, %s1626_s10   ;;  %2046 = sst [smem:[#allocation21_spill]] %s1802_s23 }
  0x33   : > { %s2047_s1 = sld [smem:[#allocation22_spill]]  ;;  %s329_s25 = scalar_lea.vmem [#allocation5], %s1789_s27 }
  0x34   : > { %s336_s26 = sshll.u32 %s329_s25, 4  ;;  %s1631_s16 = smov [#allocation10]   ;;  %s337_s26 = int_to_ptr.vmem [resolvable:$true] %s336_s26 }
  0x35   : > { %s283_s3 = sshll.u32 %s1631_s16, 4  ;;  %s1809_s13 = scalar_lea.sflag [#allocation6], %s325_s19  ;;  %s284_s3 = int_to_ptr.vmem [resolvable:$true] %s283_s3 }
  0x36   : > { %p2023_p4 = pneg %p1796_p0  ;;  %s1441_s21 = scalar_lea.vmem %s337_s26, 128 }
  0x37   : > { %p1442_p2 = scmp.ne.s32.totalorder %s337_s26, %s1441_s21  ;;  %s1632_s22 = smov [#allocation5]  }
  0x38   : > { %s1446_s9 = sshll.u32 %s1632_s22, 4  ;;  %s1447_s9 = int_to_ptr.vmem [resolvable:$false] %s1446_s9 }
  0x39   : > { %s335_s24 = scalar_lea.hbm %s2047_s1, %s1792_s8  ;;  %p1444_p7 = pnand %p1442_p2, %p2023_p4 }
  0x3a   : > { %s1448_s12 = scalar_lea.vmem %s1447_s9, 256  ;;  %p1449_p11 = scmp.lt.s32.totalorder %s337_s26, %s1447_s9 }
  0x3b   : > { %p1445_p9 = pneg %p1444_p7  ;;  %p1450_p13 = scmp.lt.s32.totalorder %s1448_s12, %s1441_s21 }
  0x3d   : > { %p1451_p3 = por %p1450_p13, %p1449_p11 }
  0x3f   : > { %p1452_p10 = pnand %p1451_p3, %p1445_p9 }
  0x41   : > { %1455 = shalt.err (!%p1452_p10)
}
  0x42   : > { %s2048_s25 = smov 4   ;;  %s2049_s19 = smov 64  }
  0x43   : > { %1311 = dma.hbm_to_vmem [thread:$0]  (!%p1796_p0), %s335_s24, 128, %s337_s26, %s1809_s13, %s2049_s19, %s2049_s19, %s2048_s25  }
  0x44   : > { %s1467_s18 = scalar_lea.vmem %s284_s3, 256  ;;  %p1475_p8 = scmp.lt.s32.totalorder %s284_s3, %s284_s3 }
  0x45   : > { %p1468_p2 = scmp.ne.s32.totalorder %s284_s3, %s1467_s18  ;;  %p1476_p6 = scmp.lt.s32.totalorder %s1467_s18, %s1467_s18 }
  0x47   : > { %p1470_p7 = pnand %p1468_p2, %p1404_p5  ;;  %p1477_p11 = por %p1476_p6, %p1475_p8 }
  0x49   : > { %p1471_p4 = pneg %p1470_p7 }
  0x4b   : > { %p1478_p9 = pnand %p1477_p11, %p1471_p4 }
  0x4d   : > { %1481 = shalt.err (!%p1478_p9)
}
  0x4e   : > { %1304 = dma.hbm_to_vmem [thread:$0]  (!%p1756_p1), %s2007_s4, 256, %s284_s3, [#allocation9], %s2049_s19, %s2049_s19, %s2048_s25  }
  0x4f   : > { %s316_s16 = scalar_lea.hbm %s2003_s0, %s1792_s8  ;;  %s310_s22 = scalar_lea.vmem [#allocation2], %s1789_s27 }
  0x50   : > { %s318_s12 = sshll.u32 %s310_s22, 4  ;;  %s356_s1 = scalar_lea.hbm %s2005_s2, %s1792_s8  ;;  %s319_s12 = int_to_ptr.vmem [resolvable:$true] %s318_s12 }
  0x51   : > { %s2050_s23 = sand.u32 1, %s1614_s29   ;;  %s1495_s9 = scalar_lea.vmem %s319_s12, 128 }
  0x52   : > { %s307_s10 = scalar_lea.sflag [#allocation3], %s2050_s23  ;;  %p1496_p6 = scmp.ne.s32.totalorder %s319_s12, %s1495_s9 }
  0x53   : > { %p2051_p8 = pneg %p1796_p0  ;;  %s1633_s3 = smov [#allocation2]  }
  0x54   : > { %s1500_s21 = sshll.u32 %s1633_s3, 4  ;;  %s1501_s21 = int_to_ptr.vmem [resolvable:$false] %s1500_s21 }
  0x55   : > { %p1498_p5 = pnand %p1496_p6, %p2051_p8  ;;  %s1502_s26 = scalar_lea.vmem %s1501_s21, 256 }
  0x56   : > { %p1503_p1 = scmp.lt.s32.totalorder %s319_s12, %s1501_s21  ;;  %p1504_p13 = scmp.lt.s32.totalorder %s1502_s26, %s1495_s9 }
  0x57   : > { %p1499_p4 = pneg %p1498_p5 }
  0x58   : > { %p1505_p3 = por %p1504_p13, %p1503_p1 }
  0x5a   : > { %p1506_p10 = pnand %p1505_p3, %p1499_p4 }
  0x5c   : > { %1509 = shalt.err (!%p1506_p10)
}
  0x5d   : > { %1308 = dma.hbm_to_vmem [thread:$0]  (!%p1796_p0), %s316_s16, 128, %s319_s12, %s307_s10  }
  0x5e   : > { %s350_s23 = scalar_lea.vmem [#allocation7], %s1789_s27  ;;  %p2052_p7 = pmov %p2051_p8 }
  0x5f   : > { %s357_s24 = sshll.u32 %s350_s23, 4  ;;  %s1634_s20 = smov [#allocation7]   ;;  %s358_s24 = int_to_ptr.vmem [resolvable:$true] %s357_s24 }
  0x60   : > { %s1523_s22 = scalar_lea.vmem %s358_s24, 128  ;;  %s1528_s18 = sshll.u32 %s1634_s20, 4  ;;  %s1529_s18 = int_to_ptr.vmem [resolvable:$false] %s1528_s18 }
  0x61   : > { %p1524_p2 = scmp.ne.s32.totalorder %s358_s24, %s1523_s22  ;;  %s1530_s9 = scalar_lea.vmem %s1529_s18, 256 }
  0x62   : > { %p1531_p6 = scmp.lt.s32.totalorder %s358_s24, %s1529_s18  ;;  %p1532_p8 = scmp.lt.s32.totalorder %s1530_s9, %s1523_s22 }
  0x63   : > { %p1526_p11 = pnand %p1524_p2, %p2052_p7 }
  0x64   : > { %p1533_p5 = por %p1532_p8, %p1531_p6 }
  0x65   : > { %p1527_p9 = pneg %p1526_p11 }
  0x67   : > { %p1534_p4 = pnand %p1533_p5, %p1527_p9 }
  0x69   : > { %1537 = shalt.err (!%p1534_p4)
}
  0x6a   : > { %1314 = dma.hbm_to_vmem [thread:$0]  (!%p1796_p0), %s356_s1, 128, %s358_s24, %s1809_s13, %s2049_s19, %s2049_s19, %s2048_s25  }
  0x6b   : > { %369 = sbr.rel (%p1747_p12) target bundleno = 1828 (0x724), region = 52  ;;  %s1867_s16 = sand.u32 (!%p1747_p12), 1, %s1610_s28  }
  0x6c   : > { %s1870_s6 = sshll.u32 (!%p1747_p12), %s1867_s16, 3  ;;  %s372_s12 = scalar_lea.sflag (!%p1747_p12), [#allocation3], %s1867_s16 }
  0x6d   : > { %s375_s3 = scalar_lea.vmem (!%p1747_p12), [#allocation2], %s1870_s6  ;;  %p2053_p1 = scmp.ne.s32.totalorder (!%p1747_p12), %s2036_s14, 0 }
  0x70   : > { %1589 = dma.done.wait (%p2053_p1), %s372_s12, 128  }
  0x71   : > { %1591 = vsyncadd (%p2053_p1), %s372_s12, 4294967168  ;;  %s380_s1 = sand.u32 1, %s1717_s11   ;;  %s384_s17 = scalar_lea.vmem [#allocation5], %s1870_s6 }
  0x72   : > { %s381_s8 = scalar_lea.sflag [#allocation6], %s380_s1 }
  0x73   : > { %1593 = dma.done.wait (%p2053_p1), %s381_s8, 256  }
  0x74   : > { %1595 = vsyncadd (%p2053_p1), %s381_s8, 4294967040  ;;  %s393_s13 = scalar_lea.vmem [#allocation7], %s1870_s6  ;;  %p2054_p12 = scmp.eq.s32.totalorder %s1717_s11, 0 }
  0x76   : > { %1597 = dma.done.wait (%p2054_p12), [#allocation9], 512   ;;  %p2055_p0 = pmov %p2054_p12 }
  0x77   : > { %vm447_vm0 = vcmask 261120   ;;  %v445_v0 = vld [vmem:[%s375_s3] sm:$0xff]  ;;  %v1382_v7 = vld [vmem:[#allocation8 + $0x8] sm:$0xff]   ;;  %v1635_v8 = vmov 0.0   ;;  %vm1636_vm1 = vmmov 0   ;;  %v1383_v9 = vld [vmem:[#allocation8] sm:$0xff]   ;;  %v537_v28 = vlaneseq }
  0x78   : > { %1599 = vsyncadd (%p2055_p0), [#allocation9], 4294966784  ;;  %v448_v1 = vsel %vm447_vm0, %v445_v0, 0.0  ;;  %1238 = vmatprep.subr.bf16.mxu0 %v1635_v8  ;;  %1242 = vmatprep.mubr.msk.bf16.mxu0 %vm1636_vm1, %v1635_v8  ;;  %v1202_v14 = vld [vmem:[%s2008_s5] ss:$0 sm:$0xff]  ;;  %vm654_vm2 = vcmask 130048  }
  0x79   : > { %449 = vadd.xlane.f32.xlu0 %v448_v1  ;;  %1239 = vmatpush3.bf16.msra.mxu0 %v1382_v7  ;;  %v652_v18 = vld [vmem:[%s384_s17] sm:$0xf]  ;;  %v653_v19 = vld [vmem:[%s384_s17 + $0x4] sm:$0xf]  ;;  %s1637_s25 = smov 112   ;;  %v1913_v30 = vshrl.u32 %v537_v28, 7 }
  0x7a   : > { %1246 = vmatprep.subr.bf16.mxu1 %v1635_v8  ;;  %1240 = vmatprep.subr.bf16.mxu0 %v1635_v8  ;;  %v659_v20 = vsel %vm654_vm2, %v652_v18, 0  ;;  %v705_v21 = vsel %vm654_vm2, %v653_v19, 0  ;;  %v1638_v26 = vmov 1983009808   ;;  %v1639_v31 = vmov 1934713408  }
  0x7b   : > { %1248 = vmatprep.mubr.msk.bf16.mxu1 %vm1636_vm1, %v1635_v8  ;;  %1247 = vmatpush3.bf16.xpose.msra.mxu1 %v659_v20  ;;  %v535_v27 = vunpack.c.l.s4 %v1638_v26  ;;  %v566_v32 = vunpack.c.l.s4 %v1639_v31  ;;  %v749_v60 = vsub.s32 0, %v1913_v30  ;;  %v1923_v61 = vld [vmem:[%s2010_s7] sm:$0x3]  ;;  %vm759_vm3 = vcmask 64512   ;;  %s2056_s24 = sld [smem:[#allocation24_spill]]  ;;  %s1218_s22 = sshll.u32 %s1618_s30, 7 }
  0x7c   : > { %1258 = vmatprep.subr.bf16.mxu1 %v1635_v8  ;;  %vm803_vm4 = vcmask 1043456   ;;  %s443_s20 = scalar_lea.vmem [#allocation11], %s1870_s6  ;;  %s2057_s10 = sld [smem:[#allocation25_spill]] }
  0x7d   : > { %1241 = vmatpush3.bf16.msra.mxu0 %v1383_v9  ;;  %v536_v29 = vunpack.c.0.s8 %v535_v27  ;;  %v567_v34 = vunpack.c.0.s8 %v566_v32  ;;  %v750_v1 = vrot.slane %v1923_v61, %v749_v60  ;;  %s1039_s18 = sshll.u32 %s443_s20, 4  ;;  %s1025_s1 = scalar_lea.sflag [#allocation4], %s1867_s16  ;;  %s1040_s18 = int_to_ptr.vmem [resolvable:$true] %s1039_s18 }
  0x7e   : > { %1252 = vmatprep.subr.bf16.mxu0 %v1635_v8  ;;  %s1538_s8 = scalar_lea.vmem %s1040_s18, 128  ;;  %p2059_p3 = scmp.ne.s32.totalorder %s2037_s15, 0 }
  0x7f   : > { %v539_v33 = vsub.s32 %v536_v29, %v1913_v30  ;;  %v570_v38 = vsub.s32 %v567_v34, %v1913_v30  ;;  %p1539_p13 = scmp.ne.s32.totalorder %s1040_s18, %s1538_s8  ;;  %s1640_s17 = smov [#allocation11]  }
  0x81   : > { %p1540_p10 = pnand %p1539_p13, %p2059_p3 }
  0x82   : > { %s2058_s12 = smov %s2057_s10  ;;  %s1037_s3 = scalar_lea.hbm %s2057_s10, %s1218_s22 }
  0x83   : > { %p1541_p2 = pneg %p1540_p10 }
 0x102   : > { %v450_v2 = vpop.xlane.xlu0 %449 }
 0x103   : > { %v452_v3 = vmul.f32 0.03125, %v450_v2 }
 0x105   : > { %v453_v4 = vsub.f32 %v445_v0, %v452_v3 }
 0x107   : > { %v454_v5 = vmul.f32 %v453_v4, %v453_v4 }
 0x109   : > { %v455_v6 = vsel %vm447_vm0, %v454_v5, 0.0 }
 0x10a   : > { %456 = vadd.xlane.f32.xlu0 %v455_v6 }
 0x193   : > { %v457_v10 = vpop.xlane.xlu0 %456 }
 0x194   : > { %v458_v11 = vmul.f32 0.03125, %v457_v10 }
 0x196   : > { %v459_v12 = vadd.f32 1e-05, %v458_v11 }
 0x198   : > { %1386 = vrsqrt.f32 %v459_v12 }
 0x1a5   : > { %v1387_v13 = vpop.eup %1386 }
 0x1a6   : > { %v461_v15 = vmul.f32 %v1387_v13, %v453_v4 }
 0x1a8   : > { %v468_v16 = vmul.f32 %v1202_v14, %v461_v15 }
 0x1aa   : > { %v469_v17 = vpack.c.bf16 %v468_v16, %v468_v16 }
 0x1ac   : > { %1243 = vmatmul.mubr.msk.bf16.vlgmr.msra.gmra.mxu0 %vm447_vm0, %v469_v17 }
 0x1ad   : > { %1254 = vmatprep.mubr.msk.bf16.mxu0 %vm1636_vm1, %v1635_v8  ;;  %1253 = vmatpush3.bf16.xpose.msra.mxu0 %v705_v21  ;;  %v790_v21 = vld [vmem:[%s393_s13] sm:$0xf] }
 0x1ae   : > { %1264 = vmatprep.subr.bf16.mxu0 %v1635_v8 }
 0x26c   : > { %v523_v22 = vpop.f32.mrf.mxu0 }
 0x26d   : > { %530 = vrot.lane.b32.xlu1 %v523_v22, %s1637_s25  ;;  %v533_v35 = vcombine.high %v523_v22, %v1635_v8  ;;  %v540_v37 = vrot.slane %v523_v22, %v539_v33  ;;  %v791_v22 = vld [vmem:[%s393_s13 + $0x4] sm:$0xf]  ;;  %s1542_s13 = sshll.u32 %s1640_s17, 4  ;;  %s1543_s13 = int_to_ptr.vmem [resolvable:$false] %s1542_s13 }
 0x26e   : > { %v1244_v23 = vpop.f32.mrf.mxu0  ;;  %s1544_s30 = scalar_lea.vmem %s1543_s13, 256  ;;  %p1545_p7 = scmp.lt.s32.totalorder %s1040_s18, %s1543_s13 }
 0x26f   : > { %v547_v41 = vrot.slane %v533_v35, %v539_v33  ;;  %v805_v23 = vsel %vm803_vm4, %v790_v21, 0  ;;  %p1546_p11 = scmp.lt.s32.totalorder %s1544_s30, %s1538_s8 }
 0x270   : > { %v526_v24 = vpop.f32.mrf.mxu0 }
 0x271   : > { %v851_v24 = vsel %vm803_vm4, %v791_v22, 0  ;;  %p1547_p9 = por %p1546_p11, %p1545_p7 }
 0x272   : > { %v1245_v25 = vpop.f32.mrf.mxu0 }
 0x273   : > { %p1548_p6 = pnand %p1547_p9, %p1541_p2 }
 0x2df   : > { %v531_v36 = vpop.permute.xlu1 %530 }
 0x2e0   : > { %v548_v39 = vcombine.high %v531_v36, %v1635_v8  ;;  %v555_v40 = vrot.slane %v531_v36, %v539_v33 }
 0x2e2   : > { %v562_v42 = vrot.slane %v548_v39, %v539_v33  ;;  %v563_v43 = vcombine.low %v540_v37, %v555_v40  ;;  %v564_v44 = vcombine.high %v540_v37, %v555_v40 }
 0x2e4   : > { %v571_v45 = vrot.slane %v563_v43, %v570_v38  ;;  %v578_v46 = vrot.slane %v564_v44, %v570_v38  ;;  %v579_v47 = vcombine.low %v547_v41, %v562_v42  ;;  %v580_v48 = vcombine.high %v547_v41, %v562_v42  ;;  %v1384_v44 = vld [vmem:[#allocation10] sm:$0xff]  }
 0x2e6   : > { %v587_v49 = vrot.slane %v579_v47, %v570_v38  ;;  %v594_v50 = vrot.slane %v580_v48, %v570_v38  ;;  %v599_v51 = vcombine.low %v571_v45, %v578_v46  ;;  %v1206_v52 = vcombine.high %v571_v45, %v578_v46  ;;  %v1385_v45 = vld [vmem:[#allocation10 + $0x8] sm:$0xff]  }
 0x2e8   : > { %v606_v53 = vrot.slane %v599_v51, %v539_v33  ;;  %v614_v54 = vrot.slane %v1206_v52, %v539_v33  ;;  %v615_v55 = vcombine.low %v587_v49, %v594_v50  ;;  %v1207_v56 = vcombine.high %v587_v49, %v594_v50 }
 0x2ea   : > { %v622_v57 = vrot.slane %v615_v55, %v539_v33  ;;  %v630_v58 = vrot.slane %v1207_v56, %v539_v33  ;;  %v631_v59 = vcombine.low %v606_v53, %v614_v54  ;;  %v796_v54 = vsub.s32 1, %v1913_v30 }
 0x2ec   : > { %v639_v62 = vcombine.low %v622_v57, %v630_v58  ;;  %v638_v63 = vrot.slane %v631_v59, %v570_v38 }
 0x2ee   : > { %v646_v0 = vrot.slane %v639_v62, %v570_v38 }
 0x2f0   : > { %v647_v2 = vcombine.low %v638_v63, %v646_v0  ;;  %v648_v3 = vcombine.high %v638_v63, %v646_v0 }
 0x2f2   : > { %v650_v4 = vpack.c.bf16 %v647_v2, %v647_v2  ;;  %v651_v5 = vpack.c.bf16 %v648_v3, %v648_v3  ;;  %v752_v6 = vmul.f32 %v750_v1, %v648_v3  ;;  %v751_v7 = vmul.f32 %v750_v1, %v647_v2 }
 0x2f4   : > { %1249 = vmatmul.mubr.msk.bf16.vlgmr.msra.gmra.mxu1 %vm654_vm2, %v650_v4  ;;  %1255 = vmatmul.mubr.msk.bf16.vlgmr.msra.gmra.mxu0 %vm654_vm2, %v651_v5  ;;  %v756_v9 = vsel %vm654_vm2, %v752_v6, 0.0  ;;  %v753_v10 = vsel %vm654_vm2, %v751_v7, 0.0 }
 0x2f5   : > { %757 = vadd.xlane.f32.xlu0 %v756_v9  ;;  %754 = vadd.xlane.f32.xlu1 %v753_v10 }
 0x2f6   : > { %1260 = vmatprep.mubr.msk.bf16.mxu1 %vm1636_vm1, %v1635_v8  ;;  %1266 = vmatprep.mubr.msk.bf16.mxu0 %vm1636_vm1, %v1635_v8 }
 0x2f7   : > { %1259 = vmatpush3.bf16.msra.mxu1 %v805_v23  ;;  %1265 = vmatpush3.bf16.msra.mxu0 %v851_v24 }
 0x2f8   : > { %1270 = vmatprep.subr.bf16.mxu1 %v1635_v8  ;;  %1276 = vmatprep.subr.bf16.mxu0 %v1635_v8 }
 0x37e   : > { %v758_v25 = vpop.xlane.xlu0 %757  ;;  %v755_v26 = vpop.xlane.xlu1 %754 }
 0x3b4   : > { %v695_v11 = vpop.f32.mrf.mxu1  ;;  %v741_v12 = vpop.f32.mrf.mxu0 }
 0x3b5   : > { %v760_v13 = vsel %vm759_vm3, %v695_v11, -inf  ;;  %v763_v18 = vsel %vm759_vm3, %v741_v12, -inf }
 0x3b6   : > { %761 = vmax.xlane.f32.xlu0 %v760_v13  ;;  %v1250_v14 = vpop.f32.mrf.mxu1  ;;  %v1256_v15 = vpop.f32.mrf.mxu0 }
 0x3b8   : > { %v698_v16 = vpop.f32.mrf.mxu1  ;;  %v744_v17 = vpop.f32.mrf.mxu0 }
 0x3ba   : > { %v1251_v19 = vpop.f32.mrf.mxu1  ;;  %764 = vmax.xlane.f32.xlu0 %v763_v18  ;;  %v1257_v20 = vpop.f32.mrf.mxu0 }
 0x43f   : > { %v762_v27 = vpop.xlane.xlu0 %761 }
 0x440   : > { %v766_v28 = vmax.f32 %v762_v27, %v755_v26 }
 0x442   : > { %v768_v29 = vsub.f32 %v755_v26, %v766_v28  ;;  %v774_v31 = vsub.f32 %v695_v11, %v766_v28 }
 0x443   : > { %v765_v32 = vpop.xlane.xlu0 %764 }
 0x444   : > { %v776_v33 = vmul.f32 1.442695, %v774_v31  ;;  %v767_v34 = vmax.f32 %v765_v32, %v758_v25  ;;  %v770_v46 = vmul.f32 1.442695, %v768_v29  ;;  %v1216_v31 = vld [vmem:[%s2056_s24] ss:$0 sm:$0xff] }
 0x446   : > { %v769_v35 = vsub.f32 %v758_v25, %v767_v34  ;;  %v775_v36 = vsub.f32 %v741_v12, %v767_v34  ;;  %1388 = vpow2.f32 %v776_v33 }
 0x448   : > { %v778_v37 = vmul.f32 1.442695, %v775_v36  ;;  %v772_v47 = vmul.f32 1.442695, %v769_v35 }
 0x44a   : > { %1390 = vpow2.f32 %v778_v37 }
 0x44b   : > { %1392 = vpow2.f32 %v770_v46 }
 0x44c   : > { %1394 = vpow2.f32 %v772_v47 }
 0x453   : > { %v1389_v38 = vpop.eup %1388 }
 0x454   : > { %v780_v39 = vsel %vm759_vm3, %v1389_v38, 0.0  ;;  %v788_v40 = vpack.c.bf16 %v1389_v38, %v1389_v38 }
 0x455   : > { %781 = vadd.xlane.f32.xlu0 %v780_v39 }
 0x456   : > { %1261 = vmatmul.mubr.msk.bf16.vlgmr.msra.gmra.mxu1 %vm759_vm3, %v788_v40 }
 0x457   : > { %v1391_v41 = vpop.eup %1390  ;;  %1272 = vmatprep.mubr.msk.bf16.mxu1 %vm1636_vm1, %v1635_v8  ;;  %1271 = vmatpush3.bf16.msra.mxu1 %v1384_v44 }
 0x458   : > { %v783_v42 = vsel %vm759_vm3, %v1391_v41, 0.0  ;;  %v789_v43 = vpack.c.bf16 %v1391_v41, %v1391_v41  ;;  %v1393_v49 = vpop.eup %1392 }
 0x459   : > { %784 = vadd.xlane.f32.xlu0 %v783_v42  ;;  %v1395_v52 = vpop.eup %1394 }
 0x45a   : > { %1267 = vmatmul.mubr.msk.bf16.vlgmr.msra.gmra.mxu0 %vm759_vm3, %v789_v43 }
 0x45b   : > { %1278 = vmatprep.mubr.msk.bf16.mxu0 %vm1636_vm1, %v1635_v8  ;;  %1277 = vmatpush3.bf16.msra.mxu0 %v1385_v45  ;;  %v797_v8 = vrot.slane %v1923_v61, %v796_v54 }
 0x45d   : > { %v798_v55 = vmul.f32 %v1393_v49, %v797_v8  ;;  %v799_v62 = vmul.f32 %v1395_v52, %v797_v8 }
 0x4de   : > { %v782_v48 = vpop.xlane.xlu0 %781 }
 0x4df   : > { %v786_v50 = vadd.f32 %v1393_v49, %v782_v48 }
 0x4e1   : > { %1396 = vrcp.f32 %v786_v50 }
 0x4e2   : > { %v785_v51 = vpop.xlane.xlu0 %784 }
 0x4e3   : > { %v787_v53 = vadd.f32 %v1395_v52, %v785_v51 }
 0x4e5   : > { %1398 = vrcp.f32 %v787_v53 }
 0x4ee   : > { %v1397_v58 = vpop.eup %1396 }
 0x4f2   : > { %v1399_v3 = vpop.eup %1398 }
 0x516   : > { %v841_v56 = vpop.f32.mrf.mxu1 }
 0x517   : > { %v842_v57 = vadd.f32 %v841_v56, %v798_v55 }
 0x518   : > { %v1262_v59 = vpop.f32.mrf.mxu1 }
 0x519   : > { %v893_v60 = vmul.f32 %v1397_v58, %v842_v57 }
 0x51a   : > { %v844_v63 = vpop.f32.mrf.mxu1  ;;  %v887_v0 = vpop.f32.mrf.mxu0 }
 0x51b   : > { %v895_v1 = vpack.c.bf16 %v893_v60, %v893_v60  ;;  %v888_v2 = vadd.f32 %v887_v0, %v799_v62 }
 0x51c   : > { %v1263_v4 = vpop.f32.mrf.mxu1  ;;  %v1268_v5 = vpop.f32.mrf.mxu0 }
 0x51d   : > { %v894_v6 = vmul.f32 %v1399_v3, %v888_v2  ;;  %1273 = vmatmul.mubr.msk.bf16.vlgmr.msra.gmra.mxu1 %vm654_vm2, %v895_v1 }
 0x51e   : > { %v890_v30 = vpop.f32.mrf.mxu0 }
 0x51f   : > { %v896_v7 = vpack.c.bf16 %v894_v6, %v894_v6 }
 0x520   : > { %v1269_v61 = vpop.f32.mrf.mxu0 }
 0x521   : > { %1279 = vmatmul.mubr.msk.bf16.vlgmr.msra.gmra.mxu0 %vm654_vm2, %v896_v7 }
 0x5dd   : > { %v944_v9 = vpop.f32.mrf.mxu1 }
 0x5de   : > { %v999_v13 = vsel %vm447_vm0, %v944_v9, 0.0 }
 0x5df   : > { %v1274_v10 = vpop.f32.mrf.mxu1 }
 0x5e1   : > { %v947_v11 = vpop.f32.mrf.mxu1  ;;  %v993_v12 = vpop.f32.mrf.mxu0 }
 0x5e2   : > { %v1000_v14 = vsel %vm447_vm0, %v993_v12, 0.0 }
 0x5e3   : > { %v1001_v15 = vadd.f32 %v1000_v14, %v999_v13  ;;  %v1275_v16 = vpop.f32.mrf.mxu1  ;;  %v1280_v17 = vpop.f32.mrf.mxu0 }
 0x5e5   : > { %v996_v18 = vpop.f32.mrf.mxu0  ;;  %v1003_v19 = vsel %vm447_vm0, %v1001_v15, 0.0 }
 0x5e6   : > { %1004 = vadd.xlane.f32.xlu0 %v1003_v19 }
 0x5e7   : > { %v1281_v20 = vpop.f32.mrf.mxu0 }
 0x66f   : > { %v1005_v21 = vpop.xlane.xlu0 %1004 }
 0x670   : > { %v1006_v22 = vmul.f32 0.03125, %v1005_v21 }
 0x672   : > { %v1007_v23 = vsub.f32 %v1001_v15, %v1006_v22 }
 0x674   : > { %v1008_v24 = vmul.f32 %v1007_v23, %v1007_v23 }
 0x676   : > { %v1009_v25 = vsel %vm447_vm0, %v1008_v24, 0.0 }
 0x677   : > { %1010 = vadd.xlane.f32.xlu0 %v1009_v25 }
 0x700   : > { %v1011_v26 = vpop.xlane.xlu0 %1010 }
 0x701   : > { %v1012_v27 = vmul.f32 0.03125, %v1011_v26 }
 0x703   : > { %v1013_v28 = vadd.f32 1e-05, %v1012_v27 }
 0x705   : > { %1400 = vrsqrt.f32 %v1013_v28 }
 0x712   : > { %v1401_v29 = vpop.eup %1400 }
 0x713   : > { %v1015_v32 = vmul.f32 %v1401_v29, %v1007_v23 }
 0x715   : > { %v1022_v33 = vmul.f32 %v1216_v31, %v1015_v32 }
 0x717   : > { %1023 = vst.msk [vmem:[%s443_s20] sm:$0xff] %vm447_vm0, %v1022_v33 }
 0x718   : > { %1551 = shalt.err (!%p1548_p6)
}
 0x719   : > { %s1552_s6 = scalar_lea.hbm %s1037_s3, 128  ;;  %s1556_s14 = scalar_lea.hbm %s2058_s12, 256 }
 0x71a   : > { %p1553_p8 = scmp.ne.s32.totalorder %s1037_s3, %s1552_s6  ;;  %p1557_p1 = scmp.lt.s32.totalorder %s1037_s3, %s2058_s12 }
 0x71b   : > { %p1558_p12 = scmp.lt.s32.totalorder %s1556_s14, %s1552_s6 }
 0x71c   : > { %p1554_p5 = pnand %p1553_p8, %p2059_p3 }
 0x71d   : > { %p1559_p0 = por %p1558_p12, %p1557_p1 }
 0x71e   : > { %p1555_p4 = pneg %p1554_p5 }
 0x720   : > { %p1560_p13 = pnand %p1559_p0, %p1555_p4 }
 0x722   : > { %1563 = shalt.err (!%p1560_p13)
}
 0x723   : > { %1296 = dma.vmem_to_hbm [thread:$0]  (%p2059_p3), %s1040_s18, 128, %s1037_s3, %s1025_s1  }
 0x724 PF: > { %s2060_s21 = sld [smem:[#allocation16_spill]] }
 0x725   : > { %s2061_s26 = sld [smem:[#allocation19_spill]] }
 0x726   : > { %s2062_s23 = sld [smem:[#allocation18_spill]] }
 0x72a   : > { %s1051_s24 = sand.u32 1, %s2060_s21  }
 0x72b   : > { %p2063_p10 = scmp.ne.s32.totalorder %s2061_s26, 0  ;;  %s1052_s22 = scalar_lea.sflag [#allocation4], %s1051_s24 }
 0x72c   : > { %p2064_p2 = scmp.ge.s32.totalorder %s2062_s23, 2 }
 0x72e   : > { %p1316_p7 = pnand %p2064_p2, %p2063_p10 }
 0x730   : > { %p1317_p11 = pneg %p1316_p7 }
 0x732   : > { %1601 = dma.done.wait (%p1317_p11), %s1052_s22, 128  }
 0x733   : > { %1603 = vsyncadd (%p1317_p11), %s1052_s22, 4294967168  ;;  %s28_s10 = sadd.s32 1, %s2062_s23   ;;  %s2065_s20 = sld [smem:[#allocation21_spill]] }
 0x734   : > { %p25_p9 = scmp.ge.s32.totalorder %s28_s10, 4   ;;  %s2066_s30 = sld [smem:[#allocation17_spill]] }
 0x735   : > { %s2067_s9 = sld [smem:[#allocation20_spill]]  ;;  %s2068_s27 = smov %s1610_s28 }
 0x736   : > { %s2069_s28 = smov %s1614_s29  ;;  %27 = sbr.rel (!%p25_p9) target bundleno = 14 (0xe), region = 129 }
 0x739   : > { %s2070_s29 = smov %s2065_s20 }
 0x73b   :  { %1057 = vsyncpa [#allocation3], 1 }
 0x73c   :  { %1059 = vsyncpa [#allocation3 + $0x1], 1 }
 0x73d   :  { %1060 = vsyncpa [#allocation6], 1 }
 0x73e   :  { %1062 = vsyncpa [#allocation6 + $0x1], 1 }
 0x73f   :  { %1063 = vsyncpa [#allocation9], 1 }
 0x740   :  { %1064 = vsyncpa [#allocation4], 1 }
 0x741   :  { %1066 = vsyncpa [#allocation4 + $0x1], 1 }

</bundles_post_ra>
